<compile_context>
chip_gen: v7x
topology: tpu7x:2x2x1
jax: 0.10.0
libtpu: 0.0.40
codegen_flags: <defaults>
</compile_context>

<pallas_src>
import jax
import jax.numpy as jnp
from jax.experimental import pallas as pl
from jax.experimental.pallas import tpu as pltpu

IN_FEATURES = 4
OUT_FEATURES = 5

_LANE = 128
_DEFAULT_BATCH_TILE = 65536     # lanes / grid step: ~8.4 MiB double-buffered VMEM
_GRIDLESS_MAX_BATCH = 131072    # single-block path: ~8 MiB resident VMEM


def _linear_fm_kernel(xt_ref, w_ref, b_ref, o_ref):
    # xt_ref: [IN, TB] (batch on lanes)   w_ref: [OUT, IN] (PyTorch layout)
    # b_ref : [OUT, 1]                    o_ref: [OUT, TB] (lane-dense)
    xt = xt_ref[...].astype(jnp.float32)
    w = w_ref[...].astype(jnp.float32)
    b = b_ref[...].astype(jnp.float32)
    # Unrolled VPU broadcast multiply-adds over the tiny K=4 contraction (no MXU).
    acc = w[:, 0:1] * xt[0:1, :] + b
    for k in range(1, IN_FEATURES):
        acc = acc + w[:, k:k + 1] * xt[k:k + 1, :]
    o_ref[...] = acc.astype(o_ref.dtype)


def _cost_estimate(batch):
    return pl.CostEstimate(
        flops=2 * batch * IN_FEATURES * OUT_FEATURES,
        bytes_accessed=4 * batch * (IN_FEATURES + OUT_FEATURES)
        + 4 * (IN_FEATURES * OUT_FEATURES + OUT_FEATURES),
        transcendentals=0,
    )


def _round_up(n, m):
    return ((n + m - 1) // m) * m


def linear_feature_major(xt, weight, bias, *,
                         batch_tile=_DEFAULT_BATCH_TILE,
                         gridless_max_batch=_GRIDLESS_MAX_BATCH):
    """Fast path: xt [IN, B] (batch on lanes) -> [OUT, B].  No transposes/pads/slices."""
    assert xt.shape[0] == IN_FEATURES
    B = xt.shape[1]
    b2 = bias.reshape(OUT_FEATURES, 1)

    if B <= gridless_max_batch:
        # Gridless call: whole problem resident in VMEM, no pipeline prologue/epilogue.
        return pl.pallas_call(
            _linear_fm_kernel,
            out_shape=jax.ShapeDtypeStruct((OUT_FEATURES, B), xt.dtype),
            in_specs=[
                pl.BlockSpec(memory_space=pltpu.MemorySpace.VMEM),
                pl.BlockSpec(memory_space=pltpu.MemorySpace.VMEM),
                pl.BlockSpec(memory_space=pltpu.MemorySpace.VMEM),
            ],
            out_specs=pl.BlockSpec(memory_space=pltpu.MemorySpace.VMEM),
            cost_estimate=_cost_estimate(B),
        )(xt, weight, b2)

    # Tiled path: lane-dense batch tiles, ragged last block masked by Pallas.
    batch_tile = max(_LANE, _round_up(int(batch_tile), _LANE))   # Mosaic lane constraint
    batch_tile = min(batch_tile, _round_up(B, _LANE))            # never exceed one pass
    n_tiles = pl.cdiv(B, batch_tile)

    # Double-buffered VMEM: in block (4->8 sublanes) + out block (5->8 sublanes), f32.
    dbuf_bytes = 2 * 2 * (8 * batch_tile * 4) + (64 << 10)
    vmem_limit = None
    if dbuf_bytes > (12 << 20):
        # Needed only for very large tiles (e.g. 128K-256K lanes on v7x); keep the
        # request well under v7x's 64 MiB physical VMEM.
        vmem_limit = int(min(dbuf_bytes + (8 << 20), 48 << 20))

    return pl.pallas_call(
        _linear_fm_kernel,
        out_shape=jax.ShapeDtypeStruct((OUT_FEATURES, B), xt.dtype),
        grid=(n_tiles,),
        in_specs=[
            pl.BlockSpec((IN_FEATURES, batch_tile), lambda i: (0, i)),
            pl.BlockSpec((OUT_FEATURES, IN_FEATURES), lambda i: (0, 0)),
            pl.BlockSpec((OUT_FEATURES, 1), lambda i: (0, 0)),
        ],
        out_specs=pl.BlockSpec((OUT_FEATURES, batch_tile), lambda i: (0, i)),
        compiler_params=pltpu.CompilerParams(
            dimension_semantics=("parallel",),   # 2-TC sharding on v7x; no-op on v5e/v6e
            vmem_limit_bytes=vmem_limit,
        ),
        cost_estimate=_cost_estimate(B),
    )(xt, weight, b2)


def linear_pallas(x, weight, bias, *, batch_tile=_DEFAULT_BATCH_TILE):
    """nn.Linear(4, 5)-compatible forward: x [..., IN] -> [..., OUT].

    Keeps the PyTorch batch-major contract; the two boundary transposes are the
    only extra HBM passes and vanish if the caller uses `linear_feature_major`
    (feature-major activations) directly, per the performance review.
    """
    lead = x.shape[:-1]
    x2 = x.reshape(-1, IN_FEATURES)
    out_t = linear_feature_major(x2.T, weight, bias, batch_tile=batch_tile)
    return out_t.T.reshape(*lead, OUT_FEATURES)


if __name__ == "__main__":
    key = jax.random.PRNGKey(0)
    kx, kw, kb, kx2 = jax.random.split(key, 4)

    # Deterministic parameter init (mimics nn.Linear's uniform(-1/sqrt(in), 1/sqrt(in)))
    bound = 1.0 / jnp.sqrt(jnp.float32(IN_FEATURES))
    weight = jax.random.uniform(
        kw, (OUT_FEATURES, IN_FEATURES), jnp.float32, minval=-bound, maxval=bound
    )
    bias = jax.random.uniform(
        kb, (OUT_FEATURES,), jnp.float32, minval=-bound, maxval=bound
    )

    # 1) Module-equivalent forward (PyTorch [B, IN] contract), gridless path.
    batch = 8
    x = jax.random.normal(kx, (batch, IN_FEATURES), jnp.float32)
    out = linear_pallas(x, weight, bias)
    jax.block_until_ready(out)
    ref = x @ weight.T + bias
    assert out.shape == (batch, OUT_FEATURES)
    assert jnp.allclose(out, ref, atol=1e-5, rtol=1e-5)

    # 2) Feature-major fast path on the tiled grid with a ragged last block
    #    (300 = 2*128 + 44) to exercise Pallas' OOB write masking (no pad/slice).
    batch2 = 300
    x2 = jax.random.normal(kx2, (batch2, IN_FEATURES), jnp.float32)
    xt2 = x2.T  # demo-only: a feature-major producer hands over this layout directly
    out_fm = linear_feature_major(xt2, weight, bias, batch_tile=128, gridless_max_batch=0)
    jax.block_until_ready(out_fm)
    ref2 = (x2 @ weight.T + bias).T
    assert out_fm.shape == (OUT_FEATURES, batch2)
    assert jnp.allclose(out_fm, ref2, atol=1e-5, rtol=1e-5)

    print("KERNEL_OK")
</pallas_src>

<mosaic_0001>
module attributes {stable_mosaic.version = 11 : i64} {
  func.func @_linear_fm_kernel(%arg0: memref<4x8xf32, #tpu.memory_space<vmem>>, %arg1: memref<5x4xf32, #tpu.memory_space<vmem>>, %arg2: memref<5x1xf32, #tpu.memory_space<vmem>>, %arg3: memref<5x8xf32, #tpu.memory_space<vmem>>) attributes {dimension_semantics = [], scalar_prefetch = 0 : i64, scratch_operands = 0 : i64, tpu.core_type = #tpu.core_type<tc>} {
    %c0 = arith.constant 0 : index
    %c0_0 = arith.constant 0 : index
    %0 = vector.load %arg0[%c0, %c0_0] : memref<4x8xf32, #tpu.memory_space<vmem>>, vector<4x8xf32>
    %c0_1 = arith.constant 0 : index
    %c0_2 = arith.constant 0 : index
    %1 = vector.load %arg1[%c0_1, %c0_2] : memref<5x4xf32, #tpu.memory_space<vmem>>, vector<5x4xf32>
    %c0_3 = arith.constant 0 : index
    %c0_4 = arith.constant 0 : index
    %2 = vector.load %arg2[%c0_3, %c0_4] : memref<5x1xf32, #tpu.memory_space<vmem>>, vector<5x1xf32>
    %3 = vector.extract_strided_slice %1 {offsets = [0, 0], sizes = [5, 1], strides = [1, 1]} : vector<5x4xf32> to vector<5x1xf32>
    %4 = vector.extract_strided_slice %0 {offsets = [0, 0], sizes = [1, 8], strides = [1, 1]} : vector<4x8xf32> to vector<1x8xf32>
    %5 = vector.broadcast %3 : vector<5x1xf32> to vector<5x8xf32>
    %6 = vector.broadcast %4 : vector<1x8xf32> to vector<5x8xf32>
    %7 = arith.mulf %5, %6 : vector<5x8xf32>
    %8 = vector.broadcast %2 : vector<5x1xf32> to vector<5x8xf32>
    %9 = arith.addf %7, %8 : vector<5x8xf32>
    %10 = vector.extract_strided_slice %1 {offsets = [0, 1], sizes = [5, 1], strides = [1, 1]} : vector<5x4xf32> to vector<5x1xf32>
    %11 = vector.extract_strided_slice %0 {offsets = [1, 0], sizes = [1, 8], strides = [1, 1]} : vector<4x8xf32> to vector<1x8xf32>
    %12 = vector.broadcast %10 : vector<5x1xf32> to vector<5x8xf32>
    %13 = vector.broadcast %11 : vector<1x8xf32> to vector<5x8xf32>
    %14 = arith.mulf %12, %13 : vector<5x8xf32>
    %15 = arith.addf %9, %14 : vector<5x8xf32>
    %16 = vector.extract_strided_slice %1 {offsets = [0, 2], sizes = [5, 1], strides = [1, 1]} : vector<5x4xf32> to vector<5x1xf32>
    %17 = vector.extract_strided_slice %0 {offsets = [2, 0], sizes = [1, 8], strides = [1, 1]} : vector<4x8xf32> to vector<1x8xf32>
    %18 = vector.broadcast %16 : vector<5x1xf32> to vector<5x8xf32>
    %19 = vector.broadcast %17 : vector<1x8xf32> to vector<5x8xf32>
    %20 = arith.mulf %18, %19 : vector<5x8xf32>
    %21 = arith.addf %15, %20 : vector<5x8xf32>
    %22 = vector.extract_strided_slice %1 {offsets = [0, 3], sizes = [5, 1], strides = [1, 1]} : vector<5x4xf32> to vector<5x1xf32>
    %23 = vector.extract_strided_slice %0 {offsets = [3, 0], sizes = [1, 8], strides = [1, 1]} : vector<4x8xf32> to vector<1x8xf32>
    %24 = vector.broadcast %22 : vector<5x1xf32> to vector<5x8xf32>
    %25 = vector.broadcast %23 : vector<1x8xf32> to vector<5x8xf32>
    %26 = arith.mulf %24, %25 : vector<5x8xf32>
    %27 = arith.addf %21, %26 : vector<5x8xf32>
    %c0_5 = arith.constant 0 : index
    %c0_6 = arith.constant 0 : index
    %28 = vector.load %arg3[%c0_5, %c0_6] : memref<5x8xf32, #tpu.memory_space<vmem>>, vector<5x8xf32>
    tpu.vector_store %arg3[%c0_5, %c0_6], %27 {strides = array<i32>} : memref<5x8xf32, #tpu.memory_space<vmem>>, vector<5x8xf32>,
    return
  }
}

</mosaic_0001>

<bundles_post_ra>
// kernel: tpu_custom_call.1
= control target key start
LH: loop header
LB: loop body
LE: loop exit
PB: predicated region body
PF: predicated region fallthrough
CT: control target
= control target key end

     0   :  { %v113_v1 = vmov 0   ;;  %v114_v2 = vmov 1   ;;  %s159_s0 = inlined_call_operand.vmem [shape: f32[4,8], index: 0, kind: input, shape index: {}]   ;;  %s160_s1 = inlined_call_operand.vmem [shape: f32[5,4], index: 1, kind: input, shape index: {}]   ;;  %s161_s2 = inlined_call_operand.vmem [shape: f32[5,1], index: 2, kind: input, shape index: {}]   ;;  %s162_s3 = inlined_call_operand.hbm [shape: f32[5,8], index: 3, kind: output, shape index: {}]  }
   0x1   :  { %v16_v0 = vld [vmem:[%s160_s1] sm:$0x1f]  ;;  %85 = vset.pattern.permute.xlu0 %v113_v1  ;;  %86 = vset.pattern.permute.xlu1 %v114_v2 }
   0x2   :  { %8 = vsyncpa [#allocation3], 0  ;;  %20 = vperm.xlu0 %85, %v16_v0   ;;  %35 = vperm.xlu1 %86, %v16_v0   ;;  %v17_v3 = vld [vmem:[%s161_s2] sm:$0x1f]  ;;  %v115_v4 = vmov 2   ;;  %v116_v5 = vmov 3   ;;  %v23_v6 = vlaneseq }
   0x3   :  { %v15_v9 = vld [vmem:[%s159_s0] sm:$0xf]  ;;  %s117_s2 = smov [#allocation2]   ;;  %vm64_vm0 = vcmask 61440  }
   0x4   :  { %v24_v7 = vshrl.u32 %v23_v6, 7  ;;  %s72_s0 = sshll.u32 %s117_s2, 4  ;;  %s73_s0 = int_to_ptr.vmem [resolvable:$true] %s72_s0 }
   0x5   :  { %s89_s17 = scalar_lea.vmem %s73_s0, 128  ;;  %p94_p1 = scmp.lt.s32.totalorder %s73_s0, %s73_s0 }
   0x6   :  { %30 = vperm.xlu0 %85, %v17_v3   ;;  %87 = vset.pattern.permute.xlu1 %v115_v4  ;;  %v25_v8 = vsub.s32 0, %v24_v7  ;;  %v40_v10 = vsub.s32 1, %v24_v7  ;;  %v50_v11 = vsub.s32 2, %v24_v7  ;;  %v60_v17 = vsub.s32 3, %v24_v7  ;;  %p90_p0 = scmp.ne.s32.totalorder %s73_s0, %s89_s17  ;;  %p95_p2 = scmp.lt.s32.totalorder %s89_s17, %s89_s17 }
   0x7   :  { %45 = vperm.xlu1 %87, %v16_v0  }
   0x8   :  { %v26_v12 = vrot.slane %v15_v9, %v25_v8  ;;  %v41_v15 = vrot.slane %v15_v9, %v40_v10  ;;  %v51_v16 = vrot.slane %v15_v9, %v50_v11  ;;  %v61_v24 = vrot.slane %v15_v9, %v60_v17  ;;  %p96_p3 = por %p95_p2, %p94_p1 }
   0xa   :  { %88 = vset.pattern.permute.xlu0 %v116_v5  ;;  %p97_p4 = pnand %p96_p3, %p90_p0 }
   0xb   :  { %55 = vperm.xlu0 %88, %v16_v0  }
  0x81   :  { %v21_v13 = vpop.permute.xlu0 %20  ;;  %v36_v14 = vpop.permute.xlu1 %35 }
  0x82   :  { %v27_v18 = vmul.f32 %v26_v12, %v21_v13  ;;  %v42_v20 = vmul.f32 %v41_v15, %v36_v14 }
  0x85   :  { %v31_v19 = vpop.permute.xlu0 %30 }
  0x86   :  { %v33_v21 = vadd.f32 %v31_v19, %v27_v18  ;;  %v46_v22 = vpop.permute.xlu1 %45 }
  0x87   :  { %v52_v23 = vmul.f32 %v51_v16, %v46_v22 }
  0x88   :  { %v43_v25 = vadd.f32 %v42_v20, %v33_v21 }
  0x8a   :  { %v53_v26 = vadd.f32 %v52_v23, %v43_v25  ;;  %v56_v27 = vpop.permute.xlu0 %55 }
  0x8b   :  { %v62_v28 = vmul.f32 %v61_v24, %v56_v27 }
  0x8d   :  { %v63_v29 = vadd.f32 %v62_v28, %v53_v26 }
  0x8f   :  { %65 = vst.msk [vmem:[#allocation2] sm:$0x1f] %vm64_vm0, %v63_v29 }
  0x90   :  { %100 = shalt.err (!%p97_p4)
}
  0x91   :  { %s101_s20 = scalar_lea.hbm %s162_s3, 128 }
  0x92   :  { %p102_p5 = scmp.ne.s32.totalorder %s162_s3, %s101_s20  ;;  %p105_p6 = scmp.lt.u32.totalorder %s101_s20, %s162_s3 }
  0x94   :  { %p107_p7 = pnand %p105_p6, %p102_p5 }
  0x96   :  { %110 = shalt.err (!%p107_p7)
}
  0x97   :  { %75 = dma.vmem_to_hbm [thread:$0]  %s73_s0, 128, %s162_s3, [#allocation3]  }
  0x98   :  { %111 = dma.done.wait [#allocation3], 128  }
  0x99   :  { %112 = vsyncadd [#allocation3], 4294967168 }
  0x9a   :  { %79 = vsyncpa [#allocation3], 1 }

</bundles_post_ra>
